<compile_context>
chip_gen: v7x
topology: tpu7x:2x2x1
jax: 0.10.0
libtpu: 0.0.40
codegen_flags: <defaults>
</compile_context>

<pallas_src>
import jax
import jax.numpy as jnp
import numpy as np
from jax.experimental import pallas as pl
from jax.experimental.pallas import tpu as pltpu


def _cpca_kernel(x_ref, w1_ref, b1_ref, w2t_ref, b2_ref, out_ref):
    """One (Bt, C, HW) block.

    x_ref   : (Bt, C, HW)  channel-major activations, lane axis = spatial
    w1_ref  : (mid, C)     fc1 weight (1x1 conv collapsed), in-channels on lanes
    b1_ref  : (1, mid)     fc1 bias (lane row)
    w2t_ref : (mid, C)     fc2 weight pre-transposed, out-channels on lanes
    b2_ref  : (1, C)       fc2 bias (lane row)
    out_ref : (Bt, C, HW)
    """
    x = x_ref[...]                                    # single HBM->VMEM read (pipelined)
    bt, _, hw = x.shape

    # ---- global pooling: lane-axis reductions (XLU), stats kept in f32 ----
    avg = jnp.sum(x, axis=2).astype(jnp.float32) * (1.0 / hw)    # (Bt, C)
    mx = jnp.max(x, axis=2).astype(jnp.float32)                  # (Bt, C)

    # ---- fused avg/max gate path: both branches share one fc1/fc2 pass ----
    pooled = jnp.concatenate([avg, mx], axis=0)                  # (2*Bt, C), lanes = C

    w1 = w1_ref[...].astype(jnp.float32)                         # (mid, C)
    b1 = b1_ref[...].astype(jnp.float32)                         # (1, mid)
    w2t = w2t_ref[...].astype(jnp.float32)                       # (mid, C)
    b2 = b2_ref[...].astype(jnp.float32)                         # (1, C)

    # fc1: broadcast multiply (VPU) + lane reduce over C (XLU)  -> (2*Bt, mid)
    h = jnp.sum(pooled[:, None, :] * w1[None, :, :], axis=-1) + b1
    h = jnp.maximum(h, 0.0)                                      # ReLU

    # fc2: broadcast multiply keeping C lane-dense + sublane reduce over mid
    g = jnp.sum(h[:, :, None] * w2t[None, :, :], axis=1) + b2    # (2*Bt, C)
    gate = jax.nn.sigmoid(g)                                     # (2*Bt, C)

    scale = gate[:bt] + gate[bt:]                                # (Bt, C): avg + max branch

    # ---- per-channel rescale, broadcast over the spatial (lane) axis ----
    out_ref[...] = (x * scale[:, :, None].astype(x.dtype)).astype(out_ref.dtype)


def _pick_batch_tile(B, per_b_bytes, target_bytes=2 << 20):
    """Largest divisor of B with block <= target, preferring >= 2 grid steps."""
    bt = 1
    for cand in range(1, B + 1):
        if B % cand:
            continue
        if cand * per_b_bytes > target_bytes:
            break
        if B // cand >= 2 or B == 1:
            bt = cand
    return bt


def cpca_channel_attention(x, w1_oihw, b1, w2_oihw, b2):
    """x: (B, C, H, W) (PyTorch NCHW).  fc1/fc2 weights in OIHW with k=1."""
    B, C, H, W = x.shape
    mid = w1_oihw.shape[0]
    HW = H * W
    dtype_bytes = jnp.dtype(x.dtype).itemsize

    # Pure reshapes (NCHW is already channel-major) + one tiny weight transpose.
    x3 = x.reshape(B, C, HW)
    w1 = w1_oihw.reshape(mid, C)                 # (mid, C)
    w2t = w2_oihw.reshape(C, mid).T              # (mid, C): out-channels on lanes
    b1r = b1.reshape(1, mid)
    b2r = b2.reshape(1, C)

    # ---- batch blocking: >= ~MiBs per grid step, >= 2 steps when possible ----
    per_b_bytes = C * HW * dtype_bytes
    bt = _pick_batch_tile(B, per_b_bytes)
    grid_b = B // bt

    # ---- explicit VMEM budget: in + out blocks double-buffered + weights ----
    block_bytes = bt * per_b_bytes
    weight_bytes = (2 * mid * C + mid + C) * 4
    need = 4 * block_bytes + 2 * weight_bytes + (8 << 20)        # + headroom
    vmem_limit = int(min(112 << 20, max(need, 16 << 20)))

    cost = pl.CostEstimate(
        flops=int(B * (3 * C * HW + 8 * C * mid)),
        transcendentals=int(2 * B * C),
        bytes_accessed=int(2 * B * C * HW * dtype_bytes + 2 * weight_bytes),
    )

    out3 = pl.pallas_call(
        _cpca_kernel,
        out_shape=jax.ShapeDtypeStruct((B, C, HW), x.dtype),
        grid_spec=pltpu.PrefetchScalarGridSpec(
            num_scalar_prefetch=0,
            grid=(grid_b,),
            in_specs=[
                pl.BlockSpec((bt, C, HW), lambda b: (b, 0, 0)),
                pl.BlockSpec((mid, C), lambda b: (0, 0)),
                pl.BlockSpec((1, mid), lambda b: (0, 0)),
                pl.BlockSpec((mid, C), lambda b: (0, 0)),
                pl.BlockSpec((1, C), lambda b: (0, 0)),
            ],
            out_specs=pl.BlockSpec((bt, C, HW), lambda b: (b, 0, 0)),
        ),
        compiler_params=pltpu.CompilerParams(
            dimension_semantics=("parallel",),
            vmem_limit_bytes=vmem_limit,
        ),
        cost_estimate=cost,
        # Output fully overwrites the activation -> reuse its HBM buffer when
        # the caller donates it (under jit); otherwise XLA inserts a copy.
        input_output_aliases={0: 0},
    )(x3, w1, b1r, w2t, b2r)

    return out3.reshape(B, C, H, W)


def _reference(x, w1_oihw, b1, w2_oihw, b2):
    """Pure-JAX reference matching the PyTorch module semantics (NCHW)."""
    w1 = w1_oihw[:, :, 0, 0]                              # (mid, C)
    w2 = w2_oihw[:, :, 0, 0]                              # (C, mid)

    def fc_chain(pooled):                                 # pooled: (B, C, 1, 1)
        h = jnp.einsum('bcij,oc->boij', pooled, w1) + b1[None, :, None, None]
        h = jnp.maximum(h, 0.0)
        g = jnp.einsum('bcij,oc->boij', h, w2) + b2[None, :, None, None]
        return jax.nn.sigmoid(g)

    avg = jnp.mean(x, axis=(2, 3), keepdims=True)
    mx = jnp.max(x, axis=(2, 3), keepdims=True)
    gate = fc_chain(avg) + fc_chain(mx)                   # (B, C, 1, 1)
    return x * gate


if __name__ == "__main__":
    B, C, H, W = 2, 4, 16, 16
    mid = 2  # internal_neurons

    key = jax.random.PRNGKey(0)
    k_x, k_w1, k_b1, k_w2, k_b2 = jax.random.split(key, 5)

    x = jax.random.normal(k_x, (B, C, H, W), jnp.float32)
    # PyTorch Conv2d(k=1) weight layout: OIHW.
    w1 = 0.3 * jax.random.normal(k_w1, (mid, C, 1, 1), jnp.float32)
    b1 = 0.1 * jax.random.normal(k_b1, (mid,), jnp.float32)
    w2 = 0.3 * jax.random.normal(k_w2, (C, mid, 1, 1), jnp.float32)
    b2 = 0.1 * jax.random.normal(k_b2, (C,), jnp.float32)

    # Reference first (it needs x), then run the kernel with the activation
    # donated so the input/output alias is actually honored.
    ref = jax.block_until_ready(_reference(x, w1, b1, w2, b2))

    run = jax.jit(cpca_channel_attention, donate_argnums=(0,))
    out = jax.block_until_ready(run(x, w1, b1, w2, b2))

    assert out.shape == (B, C, H, W)
    np.testing.assert_allclose(np.asarray(out), np.asarray(ref),
                               rtol=2e-3, atol=2e-3)

    print("KERNEL_OK")
</pallas_src>

<mosaic_0001>
module attributes {stable_mosaic.version = 11 : i64} {
  func.func @_cpca_kernel(%arg0: i32, %arg1: memref<1x4x256xf32, #tpu.memory_space<vmem>>, %arg2: memref<2x4xf32, #tpu.memory_space<vmem>>, %arg3: memref<1x2xf32, #tpu.memory_space<vmem>>, %arg4: memref<2x4xf32, #tpu.memory_space<vmem>>, %arg5: memref<1x4xf32, #tpu.memory_space<vmem>>, %arg6: memref<1x4x256xf32, #tpu.memory_space<vmem>>) attributes {dimension_semantics = [#tpu.dimension_semantics<parallel>], iteration_bounds = array<i64: 2>, scalar_prefetch = 0 : i64, scratch_operands = 0 : i64, tpu.core_type = #tpu.core_type<tc>, window_params = [{transform_indices = @transform_0, window_bounds = array<i64: 1, 4, 256>}, {pipeline_mode = #tpu.pipeline_mode<synchronous>, transform_indices = @transform_1, window_bounds = array<i64: 2, 4>}, {pipeline_mode = #tpu.pipeline_mode<synchronous>, transform_indices = @transform_2, window_bounds = array<i64: 1, 2>}, {pipeline_mode = #tpu.pipeline_mode<synchronous>, transform_indices = @transform_3, window_bounds = array<i64: 2, 4>}, {pipeline_mode = #tpu.pipeline_mode<synchronous>, transform_indices = @transform_4, window_bounds = array<i64: 1, 4>}, {transform_indices = @transform_5, window_bounds = array<i64: 1, 4, 256>}]} {
    %c0 = arith.constant 0 : index
    %c0_0 = arith.constant 0 : index
    %c0_1 = arith.constant 0 : index
    %0 = vector.load %arg1[%c0, %c0_0, %c0_1] : memref<1x4x256xf32, #tpu.memory_space<vmem>>, vector<1x4x256xf32>
    %cst = arith.constant dense<0.000000e+00> : vector<1x4xf32>
    %1 = vector.multi_reduction <add>, %0, %cst [2] : vector<1x4x256xf32> to vector<1x4xf32>
    %cst_2 = arith.constant 3.906250e-03 : f32
    %2 = vector.broadcast %cst_2 : f32 to vector<1x4xf32>
    %3 = arith.mulf %1, %2 : vector<1x4xf32>
    %cst_3 = arith.constant dense<0xFF800000> : vector<1x4xf32>
    %4 = vector.multi_reduction <maximumf>, %0, %cst_3 [2] : vector<1x4x256xf32> to vector<1x4xf32>
    %5 = tpu.concatenate %3, %4 in 0 : vector<1x4xf32>, vector<1x4xf32> -> vector<2x4xf32>
    %c0_4 = arith.constant 0 : index
    %c0_5 = arith.constant 0 : index
    %6 = vector.load %arg2[%c0_4, %c0_5] : memref<2x4xf32, #tpu.memory_space<vmem>>, vector<2x4xf32>
    %c0_6 = arith.constant 0 : index
    %c0_7 = arith.constant 0 : index
    %7 = vector.load %arg3[%c0_6, %c0_7] : memref<1x2xf32, #tpu.memory_space<vmem>>, vector<1x2xf32>
    %c0_8 = arith.constant 0 : index
    %c0_9 = arith.constant 0 : index
    %8 = vector.load %arg4[%c0_8, %c0_9] : memref<2x4xf32, #tpu.memory_space<vmem>>, vector<2x4xf32>
    %c0_10 = arith.constant 0 : index
    %c0_11 = arith.constant 0 : index
    %9 = vector.load %arg5[%c0_10, %c0_11] : memref<1x4xf32, #tpu.memory_space<vmem>>, vector<1x4xf32>
    %10 = vector.shape_cast %5 : vector<2x4xf32> to vector<2x1x4xf32>
    %11 = vector.shape_cast %6 : vector<2x4xf32> to vector<1x2x4xf32>
    %12 = vector.broadcast %10 : vector<2x1x4xf32> to vector<2x2x4xf32>
    %13 = vector.broadcast %11 : vector<1x2x4xf32> to vector<2x2x4xf32>
    %14 = arith.mulf %12, %13 : vector<2x2x4xf32>
    %cst_12 = arith.constant dense<0.000000e+00> : vector<2x2xf32>
    %15 = vector.multi_reduction <add>, %14, %cst_12 [2] : vector<2x2x4xf32> to vector<2x2xf32>
    %16 = vector.broadcast %7 : vector<1x2xf32> to vector<2x2xf32>
    %17 = arith.addf %15, %16 : vector<2x2xf32>
    %cst_13 = arith.constant 0.000000e+00 : f32
    %18 = vector.broadcast %cst_13 : f32 to vector<2x2xf32>
    %19 = arith.maximumf %17, %18 : vector<2x2xf32>
    %20 = vector.shape_cast %19 : vector<2x2xf32> to vector<2x2x1xf32>
    %21 = vector.shape_cast %8 : vector<2x4xf32> to vector<1x2x4xf32>
    %22 = vector.broadcast %20 : vector<2x2x1xf32> to vector<2x2x4xf32>
    %23 = vector.broadcast %21 : vector<1x2x4xf32> to vector<2x2x4xf32>
    %24 = arith.mulf %22, %23 : vector<2x2x4xf32>
    %cst_14 = arith.constant dense<0.000000e+00> : vector<2x4xf32>
    %25 = vector.multi_reduction <add>, %24, %cst_14 [1] : vector<2x2x4xf32> to vector<2x4xf32>
    %26 = vector.broadcast %9 : vector<1x4xf32> to vector<2x4xf32>
    %27 = arith.addf %25, %26 : vector<2x4xf32>
    %28 = arith.negf %27 : vector<2x4xf32>
    %29 = math.exp %28 : vector<2x4xf32>
    %cst_15 = arith.constant 1.000000e+00 : f32
    %30 = vector.broadcast %cst_15 : f32 to vector<2x4xf32>
    %31 = arith.addf %30, %29 : vector<2x4xf32>
    %32 = arith.divf %30, %31 : vector<2x4xf32>
    %33 = vector.extract_strided_slice %32 {offsets = [0, 0], sizes = [1, 4], strides = [1, 1]} : vector<2x4xf32> to vector<1x4xf32>
    %34 = vector.extract_strided_slice %32 {offsets = [1, 0], sizes = [1, 4], strides = [1, 1]} : vector<2x4xf32> to vector<1x4xf32>
    %35 = arith.addf %33, %34 : vector<1x4xf32>
    %36 = vector.shape_cast %35 : vector<1x4xf32> to vector<1x4x1xf32>
    %37 = vector.broadcast %36 : vector<1x4x1xf32> to vector<1x4x256xf32>
    %38 = arith.mulf %0, %37 : vector<1x4x256xf32>
    %c0_16 = arith.constant 0 : index
    %c0_17 = arith.constant 0 : index
    %c0_18 = arith.constant 0 : index
    %39 = vector.load %arg6[%c0_16, %c0_17, %c0_18] : memref<1x4x256xf32, #tpu.memory_space<vmem>>, vector<1x4x256xf32>
    tpu.vector_store %arg6[%c0_16, %c0_17, %c0_18], %38 {strides = array<i32>} : memref<1x4x256xf32, #tpu.memory_space<vmem>>, vector<1x4x256xf32>,
    return
  }
  func.func @transform_0(%arg0: i32) -> (i32, i32, i32) {
    %c0_i32 = arith.constant 0 : i32
    %c0_i32_0 = arith.constant 0 : i32
    %c0_i32_1 = arith.constant 0 : i32
    return %arg0, %c0_i32, %c0_i32_0 : i32, i32, i32
  }
  func.func @transform_1(%arg0: i32) -> (i32, i32) {
    %c0_i32 = arith.constant 0 : i32
    %c0_i32_0 = arith.constant 0 : i32
    %c0_i32_1 = arith.constant 0 : i32
    return %c0_i32, %c0_i32_0 : i32, i32
  }
  func.func @transform_2(%arg0: i32) -> (i32, i32) {
    %c0_i32 = arith.constant 0 : i32
    %c0_i32_0 = arith.constant 0 : i32
    %c0_i32_1 = arith.constant 0 : i32
    return %c0_i32, %c0_i32_0 : i32, i32
  }
  func.func @transform_3(%arg0: i32) -> (i32, i32) {
    %c0_i32 = arith.constant 0 : i32
    %c0_i32_0 = arith.constant 0 : i32
    %c0_i32_1 = arith.constant 0 : i32
    return %c0_i32, %c0_i32_0 : i32, i32
  }
  func.func @transform_4(%arg0: i32) -> (i32, i32) {
    %c0_i32 = arith.constant 0 : i32
    %c0_i32_0 = arith.constant 0 : i32
    %c0_i32_1 = arith.constant 0 : i32
    return %c0_i32, %c0_i32_0 : i32, i32
  }
  func.func @transform_5(%arg0: i32) -> (i32, i32, i32) {
    %c0_i32 = arith.constant 0 : i32
    %c0_i32_0 = arith.constant 0 : i32
    %c0_i32_1 = arith.constant 0 : i32
    return %arg0, %c0_i32, %c0_i32_0 : i32, i32, i32
  }
}

</mosaic_0001>

<bundles_post_ra>
// kernel: cpca_channel_attention.1
= control target key start
LH: loop header
LB: loop body
LE: loop exit
PB: predicated region body
PF: predicated region fallthrough
CT: control target
= control target key end

     0   :  { %s516_s18 = smov 0   ;;  %s569_s0 = inlined_call_operand.vmem [shape: f32[2,4,256], index: 0, kind: input, shape index: {}, may-alias: {0,5}]   ;;  %s570_s1 = inlined_call_operand.vmem [shape: f32[2,4], index: 1, kind: input, shape index: {}]   ;;  %s571_s2 = inlined_call_operand.vmem [shape: f32[1,2], index: 2, kind: input, shape index: {}]   ;;  %s572_s3 = inlined_call_operand.vmem [shape: f32[2,4], index: 3, kind: input, shape index: {}]   ;;  %s573_s4 = inlined_call_operand.vmem [shape: f32[1,4], index: 4, kind: input, shape index: {}]   ;;  %s574_s5 = inlined_call_operand.vmem [shape: f32[2,4,256], index: 5, kind: output, shape index: {}, may-alias: {0,5}]  }
   0x1 LB: > { %s436_s19 = sadd.s32 4294967295, %s481_s18   ;;  %p440_p0 = scmp.ge.s32.totalorder %s481_s18, 1  ;;  %s481_s18 = sphi %s516_s18, %s15_s18  }
   0x2   : > { %p187_p1 = scmp.lt.s32.totalorder %s481_s18, 3 }
   0x4   : > { %p188_p2 = pnand %p440_p0, %p187_p1 }
   0x5   : > { %p215_p3 = scmp.lt.s32.totalorder (!%p188_p2), %s436_s19, 1  ;;  %vm229_vm0 = vcmask (!%p188_p2), 1043456   ;;  %v445_v8 = vld [vmem:[%s571_s2] ss:$0 sm:$0xff] (!%p188_p2)  ;;  %v242_v9 = vlaneseq (!%p188_p2)  ;;  %v483_v10 = vmov (!%p188_p2), 1966171168  }
   0x6   : > { %191 = sbr.rel (%p188_p2) target bundleno = 625 (0x271), region = 40  ;;  %v263_v11 = vunpack.c.l.s4 (!%p188_p2), %v483_v10  ;;  %vm255_vm1 = vcmask (!%p188_p2), 1040384   ;;  %v257_v27 = vld [vmem:[%s570_s1] sm:$0x3] (!%p188_p2)  ;;  %vm296_vm2 = vcmask (!%p188_p2), 25600   ;;  %v484_v35 = vmov (!%p188_p2), 0  }
   0x7   : > { %v243_v12 = vand.u32 (!%p188_p2), 127, %v242_v9  ;;  %v541_v13 = vshrl.u32 (!%p188_p2), %v242_v9, 7  ;;  %464 = vset.pattern.permute.xlu1 (!%p188_p2), %v484_v35  ;;  %465 = vset.pattern.permute.xlu0 (!%p188_p2), %v484_v35  ;;  %v259_v43 = vld [vmem:[%s572_s3] sm:$0x3] (!%p188_p2) }
   0x8   : > { %v264_v15 = vunpack.c.0.s8 (!%p188_p2), %v263_v11  ;;  %v446_v58 = vld [vmem:[%s573_s4] ss:$0 sm:$0xff] (!%p188_p2) }
   0x9   : > { %v246_v16 = vsub.s32 (!%p188_p2), %v243_v12, %v541_v13  ;;  %v286_v24 = vsub.s32 (!%p188_p2), 0, %v541_v13  ;;  %v485_v12 = vmov (!%p188_p2), 839922192  }
   0xa   : > { %v267_v18 = vsub.s32 (!%p188_p2), %v264_v15, %v541_v13 }
   0xd   : > { %s576_s19 = smov (!%p215_p3, %s436_s19), 1 }
   0xe   : > { %s451_s20 = sshll.u32 %s576_s19, 3 }
   0xf   : > { %s219_s23 = scalar_lea.vmem %s569_s0, %s451_s20  ;;  %s224_s9 = scalar_lea.vmem %s574_s5, %s451_s20 }
  0x10   : > { %v532_v0 = vld [vmem:[%s219_s23] sm:$0xff] }
  0x11   : > { %v227_v1 = vcombine.high %v532_v0, %v532_v0  ;;  %v230_v2 = vsel %vm229_vm0, %v532_v0, 0.0  ;;  %v236_v4 = vsel %vm229_vm0, %v532_v0, -inf }
  0x13   : > { %v231_v3 = vsel %vm229_vm0, %v227_v1, 0.0  ;;  %v237_v5 = vsel %vm229_vm0, %v227_v1, -inf }
  0x14   : > { %v232_v6 = vadd.f32 %v231_v3, %v230_v2  ;;  %v238_v7 = vmax.f32 %v236_v4, %v237_v5 }
  0x16   : > { %233 = vadd.xlane.f32.xlu0 %v232_v6 }
  0x1a   : > { %239 = vmax.xlane.f32.xlu0 %v238_v7 }
  0x30   : > { %309 = vbcast.lane.b32.xlu0 %v445_v8, 256 }
  0xa3   : > { %v234_v14 = vpop.xlane.xlu0 %233 }
  0xa4   : > { %v235_v17 = vmul.f32 0.00390625, %v234_v14  ;;  %v372_v14 = vunpack.c.l.s4 %v485_v12 }
  0xa6   : > { %v247_v20 = vrot.slane %v235_v17, %v246_v16  ;;  %v373_v15 = vunpack.c.0.s8 %v372_v14 }
  0xa7   : > { %v240_v19 = vpop.xlane.xlu0 %239 }
  0xa8   : > { %v253_v21 = vrot.slane %v240_v19, %v246_v16  ;;  %v376_v16 = vsub.s32 %v373_v15, %v541_v13 }
  0xaa   : > { %v256_v22 = vsel %vm255_vm1, %v247_v20, %v253_v21 }
  0xab   : > { %v268_v23 = vrot.slane %v256_v22, %v267_v18  ;;  %v310_v36 = vpop.permute.xlu0 %309 }
  0xad   : > { %v269_v25 = vcombine.high %v268_v23, %v268_v23  ;;  %v276_v26 = vrot.slane %v268_v23, %v267_v18 }
  0xaf   : > { %v287_v28 = vrot.slane %v276_v26, %v286_v24  ;;  %v283_v29 = vrot.slane %v269_v25, %v267_v18 }
  0xb1   : > { %v294_v30 = vmul.f32 %v287_v28, %v257_v27  ;;  %v291_v31 = vrot.slane %v283_v29, %v286_v24 }
  0xb3   : > { %v297_v32 = vsel %vm296_vm2, %v294_v30, 0.0  ;;  %v295_v33 = vmul.f32 %v291_v31, %v257_v27 }
  0xb4   : > { %298 = vadd.xlane.f32.xlu1 %v297_v32 }
  0xb5   : > { %v300_v34 = vsel %vm296_vm2, %v295_v33, 0.0 }
  0xb8   : > { %301 = vadd.xlane.f32.xlu1 %v300_v34 }
 0x141   : > { %v299_v37 = vpop.xlane.xlu1 %298 }
 0x142   : > { %v312_v38 = vadd.f32 %v310_v36, %v299_v37 }
 0x144   : > { %v314_v39 = vmax.f32 %v312_v38, 0.0 }
 0x145   : > { %v302_v40 = vpop.xlane.xlu1 %301 }
 0x146   : > { %v313_v41 = vadd.f32 %v310_v36, %v302_v40  ;;  %318 = vperm.xlu1 %464, %v314_v39  }
 0x148   : > { %v315_v42 = vmax.f32 %v313_v41, 0.0 }
 0x14a   : > { %323 = vperm.xlu1 %464, %v315_v42  }
 0x1c5   : > { %v319_v44 = vpop.permute.xlu1 %318 }
 0x1c6   : > { %v326_v45 = vmul.f32 %v319_v44, %v259_v43 }
 0x1c8   : > { %v328_v46 = vsel %vm296_vm2, %v326_v45, 0.0 }
 0x1c9   : > { %v329_v47 = vrot.slane %v328_v46, 4  ;;  %v324_v48 = vpop.permute.xlu1 %323 }
 0x1ca   : > { %v327_v49 = vmul.f32 %v324_v48, %v259_v43 }
 0x1cb   : > { %v330_v50 = vadd.f32 %v329_v47, %v328_v46 }
 0x1cc   : > { %v335_v51 = vsel %vm296_vm2, %v327_v49, 0.0 }
 0x1cd   : > { %v331_v52 = vrot.slane %v330_v50, 2  ;;  %v336_v53 = vrot.slane %v335_v51, 4 }
 0x1cf   : > { %v332_v54 = vadd.f32 %v331_v52, %v330_v50  ;;  %v337_v55 = vadd.f32 %v336_v53, %v335_v51 }
 0x1d1   : > { %v333_v56 = vrot.slane %v332_v54, 1  ;;  %v338_v57 = vrot.slane %v337_v55, 2 }
 0x1d3   : > { %v334_v59 = vadd.f32 %v333_v56, %v332_v54  ;;  %v339_v60 = vadd.f32 %v338_v57, %v337_v55 }
 0x1d5   : > { %v348_v61 = vadd.f32 %v446_v58, %v334_v59  ;;  %v340_v62 = vrot.slane %v339_v60, 1 }
 0x1d7   : > { %v447_v63 = vmul.f32 -1.442695, %v348_v61  ;;  %v341_v1 = vadd.f32 %v340_v62, %v339_v60 }
 0x1d9   : > { %467 = vpow2.f32 %v447_v63  ;;  %v349_v2 = vadd.f32 %v446_v58, %v341_v1 }
 0x1db   : > { %v448_v3 = vmul.f32 -1.442695, %v349_v2 }
 0x1dd   : > { %469 = vpow2.f32 %v448_v3 }
 0x1e3   : > { %v468_v4 = vpop.eup %467 }
 0x1e4   : > { %v356_v5 = vadd.f32 1.0, %v468_v4 }
 0x1e6   : > { %471 = vrcp.f32 %v356_v5 }
 0x1e7   : > { %v470_v6 = vpop.eup %469 }
 0x1e8   : > { %v357_v7 = vadd.f32 1.0, %v470_v6 }
 0x1ea   : > { %473 = vrcp.f32 %v357_v7 }
 0x1f0   : > { %v472_v8 = vpop.eup %471 }
 0x1f4   : > { %v474_v9 = vpop.eup %473 }
 0x1f5   : > { %v362_v10 = vadd.f32 %v474_v9, %v472_v8 }
 0x1f7   : > { %v366_v11 = vrot.slane %v362_v10, %v286_v24 }
 0x1f9   : > { %368 = vbcast.lane.b32.xlu1 %v366_v11, 256 }
 0x26b   : > { %v369_v17 = vpop.permute.xlu1 %368 }
 0x26c   : > { %v377_v18 = vrot.slane %v369_v17, %v376_v16 }
 0x26e   : > { %v379_v19 = vmul.f32 %v377_v18, %v532_v0 }
 0x270   : > { %380 = vst [vmem:[%s224_s9] sm:$0xff] %v379_v19 }
 0x271 PF: > { %s15_s18 = sadd.s32 1, %s481_s18  }
 0x272   : > { %p12_p4 = scmp.ge.s32.totalorder %s15_s18, 4  }
 0x274   :  { %14 = sbr.rel (!%p12_p4) target bundleno = 1 (0x1), region = 70 }

</bundles_post_ra>
